<compile_context>
chip_gen: v7x
topology: tpu7x:2x2x1
jax: 0.10.0
libtpu: 0.0.40
codegen_flags: <defaults>
</compile_context>

<pallas_src>
import jax
import jax.numpy as jnp
from jax.experimental import pallas as pl
from jax.experimental.pallas import tpu as pltpu


def _mlp_decoder_kernel(featT_ref, w1T_ref, b1w2_ref, b2_ref, out_ref):
    # featT: (2L, TE) bf16    w1T: (H, 2L) bf16
    # b1w2:  (H, 2)  f32 (col 0 = b1, col 1 = w2)    b2: (1, 1) f32 in SMEM
    # First layer on the MXU; edges stay on the lane axis, f32 accumulation.
    hT = jnp.dot(w1T_ref[...], featT_ref[...],
                 preferred_element_type=jnp.float32)             # (H, TE) f32
    hT = jnp.maximum(hT + b1w2_ref[:, 0:1], 0.0)                 # bias + ReLU (VPU)
    # Second layer: VPU multiply + cross-sublane reduce (XLU) -> lane-dense (1, TE).
    logits = jnp.sum(hT * b1w2_ref[:, 1:2], axis=0, keepdims=True) + b2_ref[0, 0]
    out_ref[...] = jax.nn.sigmoid(logits)                        # (1, TE) f32


def _round_up(x, m):
    return ((x + m - 1) // m) * m


def _choose_edge_tile(num_edges, in_dim, hidden_dim, *, target_tile,
                      vmem_working_set_bytes):
    """Pick (tile, num_tiles, e_pad) for the edge (lane) axis."""
    # Per-lane VMEM bytes: double-buffered bf16 featT block + double-buffered
    # f32 output block + f32 hidden activations (with one temp copy).
    per_lane = 2 * in_dim * 2 + 2 * 4 + 2 * hidden_dim * 4
    fixed = 2 * hidden_dim * in_dim * 2 + 2 * hidden_dim * 2 * 4 + 4096
    tile_cap = max(128,
                   ((vmem_working_set_bytes - fixed) // per_lane) // 128 * 128)
    target = min(max(128, _round_up(target_tile, 128)), tile_cap)
    # >= 2 tiles whenever possible (keeps both v7x TensorCores busy), and size
    # the tile from cdiv(E, num_tiles) so the last tile is not mostly padding.
    nt_target = max(2, pl.cdiv(num_edges, target))
    tile = min(_round_up(pl.cdiv(num_edges, nt_target), 128), tile_cap)
    num_tiles = pl.cdiv(num_edges, tile)
    return tile, num_tiles, tile * num_tiles


def mlp_decoder_forward(z, edge_index, w1, b1, w2, b2, *, edge_tile=8192,
                        vmem_working_set_bytes=16 * 1024 * 1024):
    """Reproduces MLPDecoder.forward semantics.

    z:          (num_nodes, latent_dim) float32
    edge_index: (2, num_edges) int32
    w1: (2*latent_dim, hidden_dim), b1: (hidden_dim,)
    w2: (hidden_dim, 1),            b2: (1,)
    returns:    (num_nodes, num_nodes) float32 adjacency reconstruction
    """
    num_nodes, latent_dim = z.shape
    in_dim = 2 * latent_dim
    hidden_dim = w1.shape[1]

    row = edge_index[0].astype(jnp.int32)
    col = edge_index[1].astype(jnp.int32)
    num_edges = row.shape[0]

    tile, num_tiles, e_pad = _choose_edge_tile(
        num_edges, in_dim, hidden_dim, target_tile=edge_tile,
        vmem_working_set_bytes=vmem_working_set_bytes)

    # Build the transposed, padded feature slab directly (single write of the
    # dominant tensor, already in bf16): feat_t[:, e] = [z[row[e]]; z[col[e]]].
    pad = e_pad - num_edges
    row_pad = jnp.pad(row, (0, pad))
    col_pad = jnp.pad(col, (0, pad))
    zT = z.astype(jnp.float32).T                                   # (L, N), tiny
    feat_t = jnp.concatenate([zT[:, row_pad], zT[:, col_pad]],
                             axis=0).astype(jnp.bfloat16)          # (2L, e_pad)

    w1_t = w1.astype(jnp.bfloat16).T                               # (H, 2L)
    b1w2 = jnp.stack([b1.astype(jnp.float32),
                      w2.reshape(hidden_dim).astype(jnp.float32)],
                     axis=1)                                       # (H, 2)
    b2_c = b2.reshape(1, 1).astype(jnp.float32)                    # (1, 1) -> SMEM

    cost = pl.CostEstimate(
        flops=2 * e_pad * in_dim * hidden_dim + 4 * e_pad * hidden_dim,
        transcendentals=e_pad,
        bytes_accessed=(2 * in_dim * e_pad + 4 * e_pad
                        + 2 * in_dim * hidden_dim + 4 * 2 * hidden_dim + 4),
    )

    probs = pl.pallas_call(
        _mlp_decoder_kernel,
        out_shape=jax.ShapeDtypeStruct((1, e_pad), jnp.float32),
        grid_spec=pltpu.PrefetchScalarGridSpec(
            num_scalar_prefetch=0,
            grid=(num_tiles,),
            in_specs=[
                pl.BlockSpec((in_dim, tile), lambda i: (0, i)),        # featT
                pl.BlockSpec((hidden_dim, in_dim), lambda i: (0, 0)),  # w1T
                pl.BlockSpec((hidden_dim, 2), lambda i: (0, 0)),       # b1 | w2
                pl.BlockSpec(memory_space=pltpu.MemorySpace.SMEM),     # b2 scalar
            ],
            out_specs=pl.BlockSpec((1, tile), lambda i: (0, i)),       # lane-dense
        ),
        compiler_params=pltpu.CompilerParams(
            dimension_semantics=("parallel",),
            vmem_limit_bytes=32 * 1024 * 1024,
        ),
        cost_estimate=cost,
    )(feat_t, w1_t, b1w2, b2_c)

    edge_probs = probs[0, :num_edges]

    # Scatter into dense adjacency (glue, plain JAX).
    adj_recon = jnp.zeros((num_nodes, num_nodes), jnp.float32)
    adj_recon = adj_recon.at[row, col].set(edge_probs)
    return adj_recon


def _init_params(key, latent_dim, hidden_dim):
    """Deterministic synthetic init matching nn.Linear shapes (input-major)."""
    k1, k2, k3, k4 = jax.random.split(key, 4)
    in1 = latent_dim * 2
    lim1 = 1.0 / jnp.sqrt(in1)
    lim2 = 1.0 / jnp.sqrt(hidden_dim)
    w1 = jax.random.uniform(k1, (in1, hidden_dim), jnp.float32, -lim1, lim1)
    b1 = jax.random.uniform(k2, (hidden_dim,), jnp.float32, -lim1, lim1)
    w2 = jax.random.uniform(k3, (hidden_dim, 1), jnp.float32, -lim2, lim2)
    b2 = jax.random.uniform(k4, (1,), jnp.float32, -lim2, lim2)
    return w1, b1, w2, b2


def _reference(z, edge_index, w1, b1, w2, b2):
    row, col = edge_index[0], edge_index[1]
    feat = jnp.concatenate([z[row], z[col]], axis=1)
    h = jnp.maximum(feat @ w1 + b1, 0.0)
    probs = jax.nn.sigmoid(h @ w2 + b2)[:, 0]
    adj = jnp.zeros((z.shape[0], z.shape[0]), jnp.float32)
    return adj.at[row, col].set(probs)


if __name__ == "__main__":
    key = jax.random.PRNGKey(0)
    k_z, k_e, k_p = jax.random.split(key, 3)

    num_nodes, latent_dim, hidden_dim, num_edges = 16, 8, 32, 40

    z = jax.random.normal(k_z, (num_nodes, latent_dim), jnp.float32)
    edge_index = jax.random.randint(k_e, (2, num_edges), 0, num_nodes,
                                    dtype=jnp.int32)

    w1, b1, w2, b2 = _init_params(k_p, latent_dim, hidden_dim)

    adj = mlp_decoder_forward(z, edge_index, w1, b1, w2, b2)
    adj = jax.block_until_ready(adj)

    ref = _reference(z, edge_index, w1, b1, w2, b2)
    assert adj.shape == (num_nodes, num_nodes)
    # featT / w1T stream in bf16 -> compare against the f32 reference with a
    # correspondingly loosened tolerance.
    assert jnp.allclose(adj, ref, atol=2e-2, rtol=2e-2)

    print("KERNEL_OK")
</pallas_src>

<mosaic_0001>
module attributes {stable_mosaic.version = 11 : i64} {
  func.func @_mlp_decoder_kernel(%arg0: i32, %arg1: memref<16x128xbf16, #tpu.memory_space<vmem>>, %arg2: memref<32x16xbf16, #tpu.memory_space<vmem>>, %arg3: memref<32x2xf32, #tpu.memory_space<vmem>>, %arg4: memref<1x1xf32, #tpu.memory_space<smem>>, %arg5: memref<1x128xf32, #tpu.memory_space<vmem>>) attributes {dimension_semantics = [#tpu.dimension_semantics<parallel>], iteration_bounds = array<i64: 1>, scalar_prefetch = 0 : i64, scratch_operands = 0 : i64, tpu.core_type = #tpu.core_type<tc>, window_params = [{transform_indices = @transform_0, window_bounds = array<i64: 16, 128>}, {pipeline_mode = #tpu.pipeline_mode<synchronous>, transform_indices = @transform_1, window_bounds = array<i64: 32, 16>}, {pipeline_mode = #tpu.pipeline_mode<synchronous>, transform_indices = @transform_2, window_bounds = array<i64: 32, 2>}, {transform_indices = @transform_3, window_bounds = array<i64: 1, 1>}, {transform_indices = @transform_4, window_bounds = array<i64: 1, 128>}]} {
    %c0 = arith.constant 0 : index
    %c0_0 = arith.constant 0 : index
    %0 = vector.load %arg2[%c0, %c0_0] : memref<32x16xbf16, #tpu.memory_space<vmem>>, vector<32x16xbf16>
    %c0_1 = arith.constant 0 : index
    %c0_2 = arith.constant 0 : index
    %1 = vector.load %arg1[%c0_1, %c0_2] : memref<16x128xbf16, #tpu.memory_space<vmem>>, vector<16x128xbf16>
    %cst = arith.constant dense<0.000000e+00> : vector<32x128xf32>
    %2 = tpu.matmul %0, %1, %cst {dimension_numbers = #tpu.dot_dimension_numbers<[1], [0], [0], [1], [0, 0, 1, 1], [], []>} : vector<32x16xbf16>, vector<16x128xbf16>, vector<32x128xf32> -> vector<32x128xf32>
    %c0_3 = arith.constant 0 : index
    %c0_4 = arith.constant 0 : index
    %3 = vector.load %arg3[%c0_3, %c0_4] : memref<32x2xf32, #tpu.memory_space<vmem>>, vector<32x1xf32>
    %4 = vector.broadcast %3 : vector<32x1xf32> to vector<32x128xf32>
    %5 = arith.addf %2, %4 : vector<32x128xf32>
    %cst_5 = arith.constant 0.000000e+00 : f32
    %6 = vector.broadcast %cst_5 : f32 to vector<32x128xf32>
    %7 = arith.maximumf %5, %6 : vector<32x128xf32>
    %c0_6 = arith.constant 0 : index
    %c1 = arith.constant 1 : index
    %8 = vector.load %arg3[%c0_6, %c1] : memref<32x2xf32, #tpu.memory_space<vmem>>, vector<32x1xf32>
    %9 = vector.broadcast %8 : vector<32x1xf32> to vector<32x128xf32>
    %10 = arith.mulf %7, %9 : vector<32x128xf32>
    %cst_7 = arith.constant dense<0.000000e+00> : vector<128xf32>
    %11 = vector.multi_reduction <add>, %10, %cst_7 [0] : vector<32x128xf32> to vector<128xf32>
    %12 = vector.shape_cast %11 : vector<128xf32> to vector<1x128xf32>
    %c0_8 = arith.constant 0 : index
    %c0_9 = arith.constant 0 : index
    %13 = memref.load %arg4[%c0_8, %c0_9] : memref<1x1xf32, #tpu.memory_space<smem>>
    %14 = vector.broadcast %13 : f32 to vector<1x128xf32>
    %15 = arith.addf %12, %14 : vector<1x128xf32>
    %16 = arith.negf %15 : vector<1x128xf32>
    %17 = math.exp %16 : vector<1x128xf32>
    %cst_10 = arith.constant 1.000000e+00 : f32
    %18 = vector.broadcast %cst_10 : f32 to vector<1x128xf32>
    %19 = arith.addf %18, %17 : vector<1x128xf32>
    %20 = arith.divf %18, %19 : vector<1x128xf32>
    %c0_11 = arith.constant 0 : index
    %c0_12 = arith.constant 0 : index
    %21 = vector.load %arg5[%c0_11, %c0_12] : memref<1x128xf32, #tpu.memory_space<vmem>>, vector<1x128xf32>
    tpu.vector_store %arg5[%c0_11, %c0_12], %20 {strides = array<i32>} : memref<1x128xf32, #tpu.memory_space<vmem>>, vector<1x128xf32>,
    return
  }
  func.func @transform_0(%arg0: i32) -> (i32, i32) {
    %c0_i32 = arith.constant 0 : i32
    %c0_i32_0 = arith.constant 0 : i32
    return %c0_i32, %arg0 : i32, i32
  }
  func.func @transform_1(%arg0: i32) -> (i32, i32) {
    %c0_i32 = arith.constant 0 : i32
    %c0_i32_0 = arith.constant 0 : i32
    %c0_i32_1 = arith.constant 0 : i32
    return %c0_i32, %c0_i32_0 : i32, i32
  }
  func.func @transform_2(%arg0: i32) -> (i32, i32) {
    %c0_i32 = arith.constant 0 : i32
    %c0_i32_0 = arith.constant 0 : i32
    %c0_i32_1 = arith.constant 0 : i32
    return %c0_i32, %c0_i32_0 : i32, i32
  }
  func.func @transform_3(%arg0: i32) -> (i32, i32) {
    %c0_i32 = arith.constant 0 : i32
    %c0_i32_0 = arith.constant 0 : i32
    %c0_i32_1 = arith.constant 0 : i32
    return %c0_i32, %c0_i32_0 : i32, i32
  }
  func.func @transform_4(%arg0: i32) -> (i32, i32) {
    %c0_i32 = arith.constant 0 : i32
    %c0_i32_0 = arith.constant 0 : i32
    return %c0_i32, %arg0 : i32, i32
  }
}

</mosaic_0001>

<bundles_post_ra>
// kernel: tpu_custom_call.1
= control target key start
LH: loop header
LB: loop body
LE: loop exit
PB: predicated region body
PF: predicated region fallthrough
CT: control target
= control target key end

     0   :  { %vm66_vm0 = vcmask 130048   ;;  %v232_v3 = vmov 0   ;;  %s296_s0 = inlined_call_operand.vmem [shape: bf16[16,128], index: 0, kind: input, shape index: {}]   ;;  %s297_s1 = inlined_call_operand.vmem [shape: bf16[32,16], index: 1, kind: input, shape index: {}]   ;;  %s298_s2 = inlined_call_operand.vmem [shape: f32[32,2], index: 2, kind: input, shape index: {}]   ;;  %s299_s3 = inlined_call_operand.<no memory space> [shape: f32[1,1], index: 3, kind: input, shape index: {}]   ;;  %s300_s4 = inlined_call_operand.hbm [shape: f32[1,128], index: 4, kind: output, shape index: {}]  }
   0x1   :  { %v201_v0 = vld [vmem:[%s296_s0] sm:$0xff]   ;;  %v203_v2 = vld [vmem:[%s297_s1 + $0x8] sm:$0xff]   ;;  %198 = vset.pattern.permute.xlu1 %v232_v3  ;;  %v28_v4 = vld [vmem:[%s298_s2 + $0x10] sm:$0xff]  ;;  %197 = vset.pattern.permute.xlu0 %v232_v3 }
   0x2   :  { %v202_v1 = vld [vmem:[%s297_s1] sm:$0xff]   ;;  %188 = vmatprep.subr.bf16.mxu0 %v201_v0  ;;  %42 = vperm.xlu1 %198, %v28_v4  }
   0x3   :  { %189 = vmatpush3.bf16.msra.mxu0 %v201_v0  ;;  %190 = vmatprep.mubr.msk.bf16.mxu0 %vm66_vm0, %v202_v1  ;;  %v26_v5 = vld [vmem:[%s298_s2] sm:$0xff] }
   0x4   :  { %10 = vsyncpa [#allocation4], 0  ;;  %32 = vperm.xlu0 %197, %v26_v5   ;;  %v29_v6 = vld [vmem:[%s298_s2 + $0x18] sm:$0xff]  ;;  %v27_v7 = vld [vmem:[%s298_s2 + $0x8] sm:$0xff]  ;;  %v233_v8 = vmov 1   ;;  %v156_v41 = vstv %s299_s3  ;;  %s234_s28 = smov [#allocation3]  }
   0x5   :  { %s171_s29 = sshll.u32 %s234_s28, 4  ;;  %s172_s29 = int_to_ptr.vmem [resolvable:$true] %s171_s29 }
   0x6   :  { %191 = vmatmul.mubr.msk.bf16.vlgmr.msra.gmra.mrb[0].mxu0 %vm66_vm0, %v203_v2  ;;  %47 = vperm.xlu1 %198, %v29_v6   ;;  %s208_s30 = scalar_lea.vmem %s172_s29, 16  ;;  %s212_s5 = scalar_lea.vmem %s172_s29, 32 }
   0x7   :  { %p209_p0 = scmp.ne.s32.totalorder %s172_s29, %s208_s30  ;;  %p213_p1 = scmp.lt.s32.totalorder %s172_s29, %s172_s29 }
   0x8   :  { %37 = vperm.xlu0 %197, %v27_v7   ;;  %p214_p2 = scmp.lt.s32.totalorder %s212_s5, %s208_s30 }
   0xa   :  { %200 = vset.pattern.permute.xlu1 %v233_v8  ;;  %p215_p3 = por %p214_p2, %p213_p1 }
   0xb   :  { %131 = vperm.xlu1 %200, %v27_v7  }
   0xc   :  { %199 = vset.pattern.permute.xlu0 %v233_v8  ;;  %p216_p4 = pnand %p215_p3, %p209_p0 }
   0xd   :  { %127 = vperm.xlu0 %199, %v26_v5  }
   0xf   :  { %135 = vperm.xlu1 %200, %v28_v4  }
  0x11   :  { %139 = vperm.xlu0 %199, %v29_v6  }
  0x81   :  { %v43_v9 = vpop.permute.xlu1 %42 }
  0x83   :  { %v33_v10 = vpop.permute.xlu0 %32 }
  0x85   :  { %v48_v11 = vpop.permute.xlu1 %47 }
  0x87   :  { %v38_v12 = vpop.permute.xlu0 %37 }
  0x8a   :  { %v132_v14 = vpop.permute.xlu1 %131 }
  0x8c   :  { %v128_v19 = vpop.permute.xlu0 %127 }
  0x8e   :  { %v136_v26 = vpop.permute.xlu1 %135 }
  0x90   :  { %v140_v30 = vpop.permute.xlu0 %139 }
  0xd9   :  { %v192_v13 = vpop.f32.mrb[0].mxu0 }
  0xda   :  { %v107_v15 = vpop.f32.mrb[1].mxu0  ;;  %v116_v16 = vadd.f32 %v192_v13, %v43_v9 }
  0xdb   :  { %v108_v17 = vadd.f32 %v107_v15, %v33_v10  ;;  %v193_v18 = vpop.f32.mrb[2].mxu0 }
  0xdc   :  { %v110_v20 = vpop.f32.mrb[3].mxu0  ;;  %v119_v22 = vadd.f32 %v193_v18, %v48_v11  ;;  %v124_v24 = vmax.f32 %v116_v16, 0.0 }
  0xdd   :  { %v122_v21 = vmax.f32 %v108_v17, 0.0  ;;  %v111_v23 = vadd.f32 %v110_v20, %v38_v12 }
  0xde   :  { %v125_v28 = vmax.f32 %v119_v22, 0.0  ;;  %v144_v31 = vmul.f32 %v136_v26, %v124_v24 }
  0xdf   :  { %v123_v25 = vmax.f32 %v111_v23, 0.0  ;;  %v142_v27 = vmul.f32 %v128_v19, %v122_v21 }
  0xe0   :  { %v145_v34 = vmul.f32 %v140_v30, %v125_v28 }
  0xe1   :  { %v143_v29 = vmul.f32 %v132_v14, %v123_v25 }
  0xe3   :  { %v146_v32 = vadd.f32 %v143_v29, %v142_v27 }
  0xe5   :  { %v147_v33 = vadd.f32 %v146_v32, %v144_v31 }
  0xe7   :  { %v148_v35 = vadd.f32 %v147_v33, %v145_v34 }
  0xe9   :  { %v149_v36 = vrot.slane %v148_v35, 4 }
  0xeb   :  { %v150_v37 = vadd.f32 %v149_v36, %v148_v35 }
  0xed   :  { %v151_v38 = vrot.slane %v150_v37, 2 }
  0xef   :  { %v152_v39 = vadd.f32 %v151_v38, %v150_v37 }
  0xf1   :  { %v153_v40 = vrot.slane %v152_v39, 1 }
  0xf3   :  { %v154_v42 = vadd.f32 %v153_v40, %v152_v39 }
  0xf5   :  { %v157_v43 = vadd.f32 %v156_v41, %v154_v42 }
  0xf7   :  { %v184_v44 = vmul.f32 -1.442695, %v157_v43 }
  0xf9   :  { %204 = vpow2.f32 %v184_v44 }
 0x103   :  { %v205_v45 = vpop.eup %204 }
 0x104   :  { %v161_v46 = vadd.f32 1.0, %v205_v45 }
 0x106   :  { %206 = vrcp.f32 %v161_v46 }
 0x110   :  { %v207_v47 = vpop.eup %206 }
 0x111   :  { %164 = vst [vmem:[#allocation3] sm:$0x1] %v207_v47 }
 0x112   :  { %219 = shalt.err (!%p216_p4)
}
 0x113   :  { %s220_s7 = scalar_lea.hbm %s300_s4, 16 }
 0x114   :  { %p221_p5 = scmp.ne.s32.totalorder %s300_s4, %s220_s7  ;;  %p224_p6 = scmp.lt.u32.totalorder %s220_s7, %s300_s4 }
 0x116   :  { %p226_p7 = pnand %p224_p6, %p221_p5 }
 0x118   :  { %229 = shalt.err (!%p226_p7)
}
 0x119   :  { %174 = dma.vmem_to_hbm [thread:$0]  %s172_s29, 16, %s300_s4, [#allocation4]  }
 0x11a   :  { %230 = dma.done.wait [#allocation4], 16  }
 0x11b   :  { %231 = vsyncadd [#allocation4], 4294967280 }
 0x11c   :  { %178 = vsyncpa [#allocation4], 1 }

</bundles_post_ra>
